<compile_context>
chip_gen: v5e
topology: v5e:2x2
jax: 0.10.0
libtpu: 0.0.40
codegen_flags: <defaults>
</compile_context>

<pallas_src>
import jax
import jax.numpy as jnp
from jax.experimental import pallas as pl
from jax.experimental.pallas import tpu as pltpu


NPAD = 128  # lane-dense padded width of the 2-way classifier output


def _cdiv(a, b):
    return -(-a // b)


def _round_up(x, m):
    return (x + m - 1) // m * m


def _nsp_head_kernel(x_ref, wp_ref, bp_ref, ws_ref, bs_ref, o_ref, acc_ref):
    # x_ref : [TM, TK]   bf16 CLS hidden tile (batch tile x K chunk)
    # wp_ref: [TK, H]    bf16 pool weight chunk, [in, out] layout
    # bp_ref: [1, H]     f32 pool bias (VMEM-resident)
    # ws_ref: [H, NPAD]  bf16 classifier weight, zero-padded from [H, 2]
    # bs_ref: [1, NPAD]  f32 classifier bias, zero-padded from [1, 2]
    # o_ref : [TM, NPAD] f32 logits (cols >= 2 are zero; sliced off outside)
    # acc_ref: [TM, H]   f32 accumulator scratch (pool matmul partial sums)
    k = pl.program_id(1)

    @pl.when(k == 0)
    def _():
        acc_ref[...] = jnp.zeros_like(acc_ref)

    # tanh is elementwise, so applying it per K-chunk of x is exact.
    x = jnp.tanh(x_ref[...].astype(jnp.float32))                 # f32 tanh (EUP)
    acc_ref[...] += jnp.dot(x.astype(wp_ref.dtype), wp_ref[...],
                            preferred_element_type=jnp.float32)  # bf16 MXU, f32 acc

    @pl.when(k == pl.num_programs(1) - 1)
    def _():
        pooled = jnp.tanh(acc_ref[...] + bp_ref[...])            # f32 tanh (EUP)
        logits = jnp.dot(pooled.astype(ws_ref.dtype), ws_ref[...],
                         preferred_element_type=jnp.float32) + bs_ref[...]
        o_ref[...] = logits.astype(o_ref.dtype)


def _pick_tile_k(H):
    # K-tile only when the resident bf16 W_pool would get large for VMEM
    # (v7x: 64 MiB physical, 32 MiB scoped default).
    if H * H * 2 <= 24 * (1 << 20):
        return H
    for tk in (1024, 512, 256, 128):
        if H % tk == 0:
            return tk
    return H  # no clean divisor -> keep un-tiled (padding K would be worse)


def nsp_head(cls_hidden, w_pool_t, b_pool, w_seq_t, b_seq, *,
             tile_m=None, tile_k=None):
    """cls_hidden: [B, H]; w_pool_t: [H, H] ([in, out]); b_pool: [1, H];
    w_seq_t: [H, 2] ([in, out]); b_seq: [1, 2]. Returns [B, 2] f32 logits."""
    B, H = cls_hidden.shape
    n_cls = w_seq_t.shape[1]
    assert n_cls <= NPAD

    if tile_m is None:
        # >=2 grid steps when possible (engages v7x's second TC through the
        # "parallel" batch axis), >=4 for larger batches; cap 512 so big tiles
        # amortize per-step overhead; floor 16 (bf16 sublane-pair alignment).
        target_steps = 4 if B >= 64 else 2
        tile_m = max(16, min(512, _round_up(_cdiv(B, target_steps), 16)))
    if tile_k is None:
        tile_k = _pick_tile_k(H)
    assert H % tile_k == 0, "tile_k must divide the hidden size"
    num_m = _cdiv(B, tile_m)
    num_k = H // tile_k

    # bf16 activations + weights for the MXU; f32 accumulation / bias / tanh.
    x = cls_hidden.astype(jnp.bfloat16)
    wp = w_pool_t.astype(jnp.bfloat16)
    ws = jnp.pad(w_seq_t.astype(jnp.bfloat16), ((0, 0), (0, NPAD - n_cls)))
    bp = b_pool.reshape(1, H).astype(jnp.float32)
    bs = jnp.pad(b_seq.reshape(1, n_cls).astype(jnp.float32),
                 ((0, 0), (0, NPAD - n_cls)))

    cost = pl.CostEstimate(
        flops=2 * B * H * (H + NPAD),
        transcendentals=2 * B * H,
        bytes_accessed=(H * H + H * NPAD) * 2        # bf16 weights
                       + B * H * 2                   # bf16 activations
                       + B * NPAD * 4 + (H + NPAD) * 4)

    # VMEM footprint (worst case: everything double-buffered) + 25% headroom.
    need = (2 * tile_m * tile_k * 2                  # x tiles (bf16)
            + 2 * tile_m * NPAD * 4                  # out tiles (f32)
            + tile_m * H * 4                         # accumulator scratch (f32)
            + 2 * tile_k * H * 2                     # W_pool tiles (bf16)
            + 2 * (H * NPAD * 2 + H * 4 + NPAD * 4)) # classifier W + biases
    vmem_limit = int(min(max(need * 5 // 4, 32 * (1 << 20)), 128 * (1 << 20)))

    def build(single_buffer_weights):
        def resident(shape):
            imap = lambda i, k: (0,) * len(shape)
            if single_buffer_weights:
                return pl.BlockSpec(shape, imap, pipeline_mode=pl.Buffered(1))
            return pl.BlockSpec(shape, imap)

        if num_k == 1 and single_buffer_weights:
            # Constant block index -> no need for a second buffer.
            wp_spec = pl.BlockSpec((tile_k, H), lambda i, k: (k, 0),
                                   pipeline_mode=pl.Buffered(1))
        else:
            # K-chunked W_pool changes per step -> keep default double-buffering.
            wp_spec = pl.BlockSpec((tile_k, H), lambda i, k: (k, 0))

        return pl.pallas_call(
            _nsp_head_kernel,
            out_shape=jax.ShapeDtypeStruct((B, NPAD), jnp.float32),
            grid=(num_m, num_k),
            in_specs=[
                pl.BlockSpec((tile_m, tile_k), lambda i, k: (i, k)),  # x
                wp_spec,                                              # W_pool
                resident((1, H)),                                     # b_pool
                resident((H, NPAD)),                                  # W_seq
                resident((1, NPAD)),                                  # b_seq
            ],
            out_specs=pl.BlockSpec((tile_m, NPAD), lambda i, k: (i, 0)),
            scratch_shapes=[pltpu.VMEM((tile_m, H), jnp.float32)],
            compiler_params=pltpu.CompilerParams(
                dimension_semantics=("parallel", "arbitrary"),
                vmem_limit_bytes=vmem_limit),
            cost_estimate=cost,
        )

    try:
        out = build(True)(x, wp, bp, ws, bs)
    except Exception:
        # pipeline_mode=pl.Buffered(1) unsupported on this jax version ->
        # fall back to default double-buffering of the resident operands.
        out = build(False)(x, wp, bp, ws, bs)

    return out[:, :n_cls]


def backbone_stand_in(input_ids, token_type_ids, attention_mask, params):
    """Deterministic stand-in for self.model(...): returns [B, S, H] hidden states.
    Plain-JAX glue (embedding lookups), not the hot path."""
    word_emb = params["word_emb"][input_ids]            # [B, S, H]
    tt_emb = params["tt_emb"][token_type_ids]           # [B, S, H]
    S = input_ids.shape[1]
    pos_emb = params["pos_emb"][:S][None, :, :]         # [1, S, H]
    hidden = word_emb + tt_emb + pos_emb
    hidden = hidden * attention_mask[..., None].astype(hidden.dtype)
    return hidden


def nsp_forward(input_ids, token_type_ids, attention_mask, params, cls_pos=0):
    hidden = backbone_stand_in(input_ids, token_type_ids, attention_mask, params)
    cls_hidden = hidden[:, cls_pos]                     # [B, H] (fuses into producer)
    return nsp_head(cls_hidden,
                    params["w_pool_t"], params["b_pool"],
                    params["w_seq_t"], params["b_seq"])


def _nsp_head_ref(cls_hidden, w_pool_t, b_pool, w_seq_t, b_seq):
    pooled = jnp.tanh(jnp.tanh(cls_hidden) @ w_pool_t + b_pool)
    return pooled @ w_seq_t + b_seq


if __name__ == "__main__":
    B, S, H, V = 2, 8, 32, 64

    key = jax.random.PRNGKey(0)
    keys = jax.random.split(key, 13)

    # Deterministic parameter init (synthetic; no checkpoint load).
    params = {
        "word_emb": jax.random.normal(keys[0], (V, H), jnp.float32) * 0.02,
        "tt_emb":   jax.random.normal(keys[1], (2, H), jnp.float32) * 0.02,
        "pos_emb":  jax.random.normal(keys[2], (S, H), jnp.float32) * 0.02,
        # PyTorch Linear stores weight as [out, in]; we pre-transpose to [in, out].
        "w_pool_t": (jax.random.normal(keys[3], (H, H), jnp.float32) * 0.05).T,
        "b_pool":   jax.random.normal(keys[4], (1, H), jnp.float32) * 0.05,
        "w_seq_t":  (jax.random.normal(keys[5], (2, H), jnp.float32) * 0.05).T,
        "b_seq":    jax.random.normal(keys[6], (1, 2), jnp.float32) * 0.05,
    }

    input_ids = jax.random.randint(keys[7], (B, S), 0, V, dtype=jnp.int32)
    token_type_ids = jnp.concatenate(
        [jnp.zeros((B, S // 2), jnp.int32), jnp.ones((B, S // 2), jnp.int32)], axis=1)
    attention_mask = jnp.ones((B, S), jnp.int32)

    # --- check 1: full forward at the toy module sizes (B=2, ragged block) ---
    logits = nsp_forward(input_ids, token_type_ids, attention_mask, params, cls_pos=0)
    logits = jax.block_until_ready(logits)

    hidden = backbone_stand_in(input_ids, token_type_ids, attention_mask, params)
    ref = _nsp_head_ref(hidden[:, 0], params["w_pool_t"], params["b_pool"],
                        params["w_seq_t"], params["b_seq"])
    assert logits.shape == (B, 2)
    # bf16 activations + weights on the MXU (f32 accumulation) => looser tol.
    assert jnp.allclose(logits, ref, atol=2e-2, rtol=2e-2)

    # --- check 2: multi-M grid + ragged last block + K-tiled pool matmul -----
    B2, H2 = 20, 256
    cls2 = jax.random.normal(keys[8], (B2, H2), jnp.float32) * 0.5
    wp2 = (jax.random.normal(keys[9], (H2, H2), jnp.float32) * 0.05).T
    bp2 = jax.random.normal(keys[10], (1, H2), jnp.float32) * 0.05
    ws2 = (jax.random.normal(keys[11], (2, H2), jnp.float32) * 0.05).T
    bs2 = jax.random.normal(keys[12], (1, 2), jnp.float32) * 0.05
    logits2 = nsp_head(cls2, wp2, bp2, ws2, bs2, tile_m=16, tile_k=128)
    logits2 = jax.block_until_ready(logits2)
    ref2 = _nsp_head_ref(cls2, wp2, bp2, ws2, bs2)
    assert logits2.shape == (B2, 2)
    assert jnp.allclose(logits2, ref2, atol=2e-2, rtol=2e-2)

    print("KERNEL_OK")
</pallas_src>

<mosaic_0001>
module attributes {stable_mosaic.version = 11 : i64} {
  func.func @_nsp_head_kernel(%arg0: i32, %arg1: i32, %arg2: memref<16x32xbf16, #tpu.memory_space<vmem>>, %arg3: memref<32x32xbf16, #tpu.memory_space<vmem>>, %arg4: memref<1x32xf32, #tpu.memory_space<vmem>>, %arg5: memref<32x128xbf16, #tpu.memory_space<vmem>>, %arg6: memref<1x128xf32, #tpu.memory_space<vmem>>, %arg7: memref<16x128xf32, #tpu.memory_space<vmem>>, %arg8: memref<16x32xf32, #tpu.memory_space<vmem>>) attributes {dimension_semantics = [#tpu.dimension_semantics<parallel>, #tpu.dimension_semantics<arbitrary>], iteration_bounds = array<i64: 1, 1>, scalar_prefetch = 0 : i64, scratch_operands = 1 : i64, tpu.core_type = #tpu.core_type<tc>, window_params = [{transform_indices = @transform_0, window_bounds = array<i64: 16, 32>}, {pipeline_mode = #tpu.pipeline_mode<synchronous>, transform_indices = @transform_1, window_bounds = array<i64: 32, 32>}, {pipeline_mode = #tpu.pipeline_mode<synchronous>, transform_indices = @transform_2, window_bounds = array<i64: 1, 32>}, {pipeline_mode = #tpu.pipeline_mode<synchronous>, transform_indices = @transform_3, window_bounds = array<i64: 32, 128>}, {pipeline_mode = #tpu.pipeline_mode<synchronous>, transform_indices = @transform_4, window_bounds = array<i64: 1, 128>}, {transform_indices = @transform_5, window_bounds = array<i64: 16, 128>}]} {
    %c0_i32 = arith.constant 0 : i32
    %0 = arith.cmpi eq, %arg1, %c0_i32 : i32
    %1 = arith.extui %0 : i1 to i32
    %c0_i32_0 = arith.constant 0 : i32
    %2 = arith.cmpi ne, %1, %c0_i32_0 : i32
    scf.if %2 {
      %cst_10 = arith.constant 0.000000e+00 : f32
      %15 = vector.broadcast %cst_10 : f32 to vector<16x32xf32>
      %c0_11 = arith.constant 0 : index
      %c0_12 = arith.constant 0 : index
      %16 = vector.load %arg8[%c0_11, %c0_12] : memref<16x32xf32, #tpu.memory_space<vmem>>, vector<16x32xf32>
      tpu.vector_store %arg8[%c0_11, %c0_12], %15 {strides = array<i32>} : memref<16x32xf32, #tpu.memory_space<vmem>>, vector<16x32xf32>,
    } else {
    }
    %c0 = arith.constant 0 : index
    %c0_1 = arith.constant 0 : index
    %3 = vector.load %arg2[%c0, %c0_1] : memref<16x32xbf16, #tpu.memory_space<vmem>>, vector<16x32xbf16>
    %4 = arith.extf %3 : vector<16x32xbf16> to vector<16x32xf32>
    %5 = math.tanh %4 : vector<16x32xf32>
    %c0_2 = arith.constant 0 : index
    %c0_3 = arith.constant 0 : index
    %6 = vector.load %arg8[%c0_2, %c0_3] : memref<16x32xf32, #tpu.memory_space<vmem>>, vector<16x32xf32>
    %7 = arith.truncf %5 : vector<16x32xf32> to vector<16x32xbf16>
    %c0_4 = arith.constant 0 : index
    %c0_5 = arith.constant 0 : index
    %8 = vector.load %arg3[%c0_4, %c0_5] : memref<32x32xbf16, #tpu.memory_space<vmem>>, vector<32x32xbf16>
    %cst = arith.constant dense<0.000000e+00> : vector<16x32xf32>
    %9 = tpu.matmul %7, %8, %cst {dimension_numbers = #tpu.dot_dimension_numbers<[1], [0], [0], [1], [0, 0, 1, 1], [], []>} : vector<16x32xbf16>, vector<32x32xbf16>, vector<16x32xf32> -> vector<16x32xf32>
    %10 = arith.addf %6, %9 : vector<16x32xf32>
    %c0_6 = arith.constant 0 : index
    %c0_7 = arith.constant 0 : index
    %11 = vector.load %arg8[%c0_6, %c0_7] : memref<16x32xf32, #tpu.memory_space<vmem>>, vector<16x32xf32>
    tpu.vector_store %arg8[%c0_6, %c0_7], %10 {strides = array<i32>} : memref<16x32xf32, #tpu.memory_space<vmem>>, vector<16x32xf32>,
    %c0_i32_8 = arith.constant 0 : i32
    %12 = arith.cmpi eq, %arg1, %c0_i32_8 : i32
    %13 = arith.extui %12 : i1 to i32
    %c0_i32_9 = arith.constant 0 : i32
    %14 = arith.cmpi ne, %13, %c0_i32_9 : i32
    scf.if %14 {
      %c0_10 = arith.constant 0 : index
      %c0_11 = arith.constant 0 : index
      %15 = vector.load %arg8[%c0_10, %c0_11] : memref<16x32xf32, #tpu.memory_space<vmem>>, vector<16x32xf32>
      %c0_12 = arith.constant 0 : index
      %c0_13 = arith.constant 0 : index
      %16 = vector.load %arg4[%c0_12, %c0_13] : memref<1x32xf32, #tpu.memory_space<vmem>>, vector<1x32xf32>
      %17 = vector.broadcast %16 : vector<1x32xf32> to vector<16x32xf32>
      %18 = arith.addf %15, %17 : vector<16x32xf32>
      %19 = math.tanh %18 : vector<16x32xf32>
      %20 = arith.truncf %19 : vector<16x32xf32> to vector<16x32xbf16>
      %c0_14 = arith.constant 0 : index
      %c0_15 = arith.constant 0 : index
      %21 = vector.load %arg5[%c0_14, %c0_15] : memref<32x128xbf16, #tpu.memory_space<vmem>>, vector<32x128xbf16>
      %cst_16 = arith.constant dense<0.000000e+00> : vector<16x128xf32>
      %22 = tpu.matmul %20, %21, %cst_16 {dimension_numbers = #tpu.dot_dimension_numbers<[1], [0], [0], [1], [0, 0, 1, 1], [], []>} : vector<16x32xbf16>, vector<32x128xbf16>, vector<16x128xf32> -> vector<16x128xf32>
      %c0_17 = arith.constant 0 : index
      %c0_18 = arith.constant 0 : index
      %23 = vector.load %arg6[%c0_17, %c0_18] : memref<1x128xf32, #tpu.memory_space<vmem>>, vector<1x128xf32>
      %24 = vector.broadcast %23 : vector<1x128xf32> to vector<16x128xf32>
      %25 = arith.addf %22, %24 : vector<16x128xf32>
      %c0_19 = arith.constant 0 : index
      %c0_20 = arith.constant 0 : index
      %26 = vector.load %arg7[%c0_19, %c0_20] : memref<16x128xf32, #tpu.memory_space<vmem>>, vector<16x128xf32>
      tpu.vector_store %arg7[%c0_19, %c0_20], %25 {strides = array<i32>} : memref<16x128xf32, #tpu.memory_space<vmem>>, vector<16x128xf32>,
    } else {
    }
    return
  }
  func.func @transform_0(%arg0: i32, %arg1: i32) -> (i32, i32) {
    %c0_i32 = arith.constant 0 : i32
    return %arg0, %arg1 : i32, i32
  }
  func.func @transform_1(%arg0: i32, %arg1: i32) -> (i32, i32) {
    %c0_i32 = arith.constant 0 : i32
    %c0_i32_0 = arith.constant 0 : i32
    return %arg1, %c0_i32 : i32, i32
  }
  func.func @transform_2(%arg0: i32, %arg1: i32) -> (i32, i32) {
    %c0_i32 = arith.constant 0 : i32
    %c0_i32_0 = arith.constant 0 : i32
    %c0_i32_1 = arith.constant 0 : i32
    return %c0_i32, %c0_i32_0 : i32, i32
  }
  func.func @transform_3(%arg0: i32, %arg1: i32) -> (i32, i32) {
    %c0_i32 = arith.constant 0 : i32
    %c0_i32_0 = arith.constant 0 : i32
    %c0_i32_1 = arith.constant 0 : i32
    return %c0_i32, %c0_i32_0 : i32, i32
  }
  func.func @transform_4(%arg0: i32, %arg1: i32) -> (i32, i32) {
    %c0_i32 = arith.constant 0 : i32
    %c0_i32_0 = arith.constant 0 : i32
    %c0_i32_1 = arith.constant 0 : i32
    return %c0_i32, %c0_i32_0 : i32, i32
  }
  func.func @transform_5(%arg0: i32, %arg1: i32) -> (i32, i32) {
    %c0_i32 = arith.constant 0 : i32
    %c0_i32_0 = arith.constant 0 : i32
    return %arg0, %c0_i32 : i32, i32
  }
}

module attributes {stable_mosaic.version = 11 : i64} {
  func.func @_nsp_head_kernel(%arg0: i32, %arg1: i32, %arg2: memref<16x32xbf16, #tpu.memory_space<vmem>>, %arg3: memref<32x32xbf16, #tpu.memory_space<vmem>>, %arg4: memref<1x32xf32, #tpu.memory_space<vmem>>, %arg5: memref<32x128xbf16, #tpu.memory_space<vmem>>, %arg6: memref<1x128xf32, #tpu.memory_space<vmem>>, %arg7: memref<16x128xf32, #tpu.memory_space<vmem>>, %arg8: memref<16x32xf32, #tpu.memory_space<vmem>>) attributes {dimension_semantics = [#tpu.dimension_semantics<parallel>, #tpu.dimension_semantics<arbitrary>], iteration_bounds = array<i64: 1, 1>, scalar_prefetch = 0 : i64, scratch_operands = 1 : i64, tpu.core_type = #tpu.core_type<tc>, window_params = [{transform_indices = @transform_0, window_bounds = array<i64: 16, 32>}, {transform_indices = @transform_1, window_bounds = array<i64: 32, 32>}, {pipeline_mode = #tpu.pipeline_mode<synchronous>, transform_indices = @transform_2, window_bounds = array<i64: 1, 32>}, {pipeline_mode = #tpu.pipeline_mode<synchronous>, transform_indices = @transform_3, window_bounds = array<i64: 32, 128>}, {pipeline_mode = #tpu.pipeline_mode<synchronous>, transform_indices = @transform_4, window_bounds = array<i64: 1, 128>}, {transform_indices = @transform_5, window_bounds = array<i64: 16, 128>}]} {
    %c0_i32 = arith.constant 0 : i32
    %0 = arith.cmpi eq, %arg1, %c0_i32 : i32
    %1 = arith.extui %0 : i1 to i32
    %c0_i32_0 = arith.constant 0 : i32
    %2 = arith.cmpi ne, %1, %c0_i32_0 : i32
    scf.if %2 {
      %cst_10 = arith.constant 0.000000e+00 : f32
      %15 = vector.broadcast %cst_10 : f32 to vector<16x32xf32>
      %c0_11 = arith.constant 0 : index
      %c0_12 = arith.constant 0 : index
      %16 = vector.load %arg8[%c0_11, %c0_12] : memref<16x32xf32, #tpu.memory_space<vmem>>, vector<16x32xf32>
      tpu.vector_store %arg8[%c0_11, %c0_12], %15 {strides = array<i32>} : memref<16x32xf32, #tpu.memory_space<vmem>>, vector<16x32xf32>,
    } else {
    }
    %c0 = arith.constant 0 : index
    %c0_1 = arith.constant 0 : index
    %3 = vector.load %arg2[%c0, %c0_1] : memref<16x32xbf16, #tpu.memory_space<vmem>>, vector<16x32xbf16>
    %4 = arith.extf %3 : vector<16x32xbf16> to vector<16x32xf32>
    %5 = math.tanh %4 : vector<16x32xf32>
    %c0_2 = arith.constant 0 : index
    %c0_3 = arith.constant 0 : index
    %6 = vector.load %arg8[%c0_2, %c0_3] : memref<16x32xf32, #tpu.memory_space<vmem>>, vector<16x32xf32>
    %7 = arith.truncf %5 : vector<16x32xf32> to vector<16x32xbf16>
    %c0_4 = arith.constant 0 : index
    %c0_5 = arith.constant 0 : index
    %8 = vector.load %arg3[%c0_4, %c0_5] : memref<32x32xbf16, #tpu.memory_space<vmem>>, vector<32x32xbf16>
    %cst = arith.constant dense<0.000000e+00> : vector<16x32xf32>
    %9 = tpu.matmul %7, %8, %cst {dimension_numbers = #tpu.dot_dimension_numbers<[1], [0], [0], [1], [0, 0, 1, 1], [], []>} : vector<16x32xbf16>, vector<32x32xbf16>, vector<16x32xf32> -> vector<16x32xf32>
    %10 = arith.addf %6, %9 : vector<16x32xf32>
    %c0_6 = arith.constant 0 : index
    %c0_7 = arith.constant 0 : index
    %11 = vector.load %arg8[%c0_6, %c0_7] : memref<16x32xf32, #tpu.memory_space<vmem>>, vector<16x32xf32>
    tpu.vector_store %arg8[%c0_6, %c0_7], %10 {strides = array<i32>} : memref<16x32xf32, #tpu.memory_space<vmem>>, vector<16x32xf32>,
    %c0_i32_8 = arith.constant 0 : i32
    %12 = arith.cmpi eq, %arg1, %c0_i32_8 : i32
    %13 = arith.extui %12 : i1 to i32
    %c0_i32_9 = arith.constant 0 : i32
    %14 = arith.cmpi ne, %13, %c0_i32_9 : i32
    scf.if %14 {
      %c0_10 = arith.constant 0 : index
      %c0_11 = arith.constant 0 : index
      %15 = vector.load %arg8[%c0_10, %c0_11] : memref<16x32xf32, #tpu.memory_space<vmem>>, vector<16x32xf32>
      %c0_12 = arith.constant 0 : index
      %c0_13 = arith.constant 0 : index
      %16 = vector.load %arg4[%c0_12, %c0_13] : memref<1x32xf32, #tpu.memory_space<vmem>>, vector<1x32xf32>
      %17 = vector.broadcast %16 : vector<1x32xf32> to vector<16x32xf32>
      %18 = arith.addf %15, %17 : vector<16x32xf32>
      %19 = math.tanh %18 : vector<16x32xf32>
      %20 = arith.truncf %19 : vector<16x32xf32> to vector<16x32xbf16>
      %c0_14 = arith.constant 0 : index
      %c0_15 = arith.constant 0 : index
      %21 = vector.load %arg5[%c0_14, %c0_15] : memref<32x128xbf16, #tpu.memory_space<vmem>>, vector<32x128xbf16>
      %cst_16 = arith.constant dense<0.000000e+00> : vector<16x128xf32>
      %22 = tpu.matmul %20, %21, %cst_16 {dimension_numbers = #tpu.dot_dimension_numbers<[1], [0], [0], [1], [0, 0, 1, 1], [], []>} : vector<16x32xbf16>, vector<32x128xbf16>, vector<16x128xf32> -> vector<16x128xf32>
      %c0_17 = arith.constant 0 : index
      %c0_18 = arith.constant 0 : index
      %23 = vector.load %arg6[%c0_17, %c0_18] : memref<1x128xf32, #tpu.memory_space<vmem>>, vector<1x128xf32>
      %24 = vector.broadcast %23 : vector<1x128xf32> to vector<16x128xf32>
      %25 = arith.addf %22, %24 : vector<16x128xf32>
      %c0_19 = arith.constant 0 : index
      %c0_20 = arith.constant 0 : index
      %26 = vector.load %arg7[%c0_19, %c0_20] : memref<16x128xf32, #tpu.memory_space<vmem>>, vector<16x128xf32>
      tpu.vector_store %arg7[%c0_19, %c0_20], %25 {strides = array<i32>} : memref<16x128xf32, #tpu.memory_space<vmem>>, vector<16x128xf32>,
    } else {
    }
    return
  }
  func.func @transform_0(%arg0: i32, %arg1: i32) -> (i32, i32) {
    %c0_i32 = arith.constant 0 : i32
    return %arg0, %arg1 : i32, i32
  }
  func.func @transform_1(%arg0: i32, %arg1: i32) -> (i32, i32) {
    %c0_i32 = arith.constant 0 : i32
    %c0_i32_0 = arith.constant 0 : i32
    return %arg1, %c0_i32 : i32, i32
  }
  func.func @transform_2(%arg0: i32, %arg1: i32) -> (i32, i32) {
    %c0_i32 = arith.constant 0 : i32
    %c0_i32_0 = arith.constant 0 : i32
    %c0_i32_1 = arith.constant 0 : i32
    return %c0_i32, %c0_i32_0 : i32, i32
  }
  func.func @transform_3(%arg0: i32, %arg1: i32) -> (i32, i32) {
    %c0_i32 = arith.constant 0 : i32
    %c0_i32_0 = arith.constant 0 : i32
    %c0_i32_1 = arith.constant 0 : i32
    return %c0_i32, %c0_i32_0 : i32, i32
  }
  func.func @transform_4(%arg0: i32, %arg1: i32) -> (i32, i32) {
    %c0_i32 = arith.constant 0 : i32
    %c0_i32_0 = arith.constant 0 : i32
    %c0_i32_1 = arith.constant 0 : i32
    return %c0_i32, %c0_i32_0 : i32, i32
  }
  func.func @transform_5(%arg0: i32, %arg1: i32) -> (i32, i32) {
    %c0_i32 = arith.constant 0 : i32
    %c0_i32_0 = arith.constant 0 : i32
    return %arg0, %c0_i32 : i32, i32
  }
}

</mosaic_0001>

<bundles_post_ra>
// kernel: tpu_custom_call.1
= control target key start
LH: loop header
LB: loop body
LE: loop exit
PB: predicated region body
PF: predicated region fallthrough
CT: control target
= control target key end

     0   :  { %10 = vsyncpa [#allocation4], 0  ;;  %s463_s0 = inlined_call_operand.hbm [shape: bf16[2,32], index: 0, kind: input, shape index: {}]   ;;  %s464_s1 = inlined_call_operand.hbm [shape: bf16[32,32], index: 1, kind: input, shape index: {}]   ;;  %s465_s2 = inlined_call_operand.vmem [shape: f32[1,32], index: 2, kind: input, shape index: {}]   ;;  %s466_s3 = inlined_call_operand.hbm [shape: bf16[32,128], index: 3, kind: input, shape index: {}]   ;;  %s467_s4 = inlined_call_operand.vmem [shape: f32[1,128], index: 4, kind: input, shape index: {}]   ;;  %s468_s5 = inlined_call_operand.hbm [shape: f32[2,128], index: 5, kind: output, shape index: {}]  }
   0x1   :  { %11 = vsyncpa [#allocation7], 0 }
   0x2   :  { %12 = vsyncpa [#allocation5], 0  ;;  %s30_s20 = sshll.u32 %s464_s1, 4  ;;  %s31_s20 = int_to_ptr.hbm [resolvable:$true] %s30_s20 }
   0x3   :  { %16 = vsyncadd [#allocation4], 112  ;;  %s398_s21 = smov [#allocation6]   ;;  %s17_s25 = sshll.u32 %s463_s0, 4  ;;  %s18_s25 = int_to_ptr.hbm [resolvable:$true] %s17_s25 }
   0x4   :  { %s32_s22 = sshll.u32 %s398_s21, 4  ;;  %s399_s26 = smov 64   ;;  %s33_s22 = int_to_ptr.vmem [resolvable:$true] %s32_s22 }
   0x5   :  { %s400_s27 = smov 4   ;;  %s401_s28 = smov [#allocation3]  }
   0x6   :  { %38 = dma.hbm_to_vmem [thread:$0]  %s31_s20, 256, %s33_s22, [#allocation7], %s399_s26, %s399_s26, %s400_s27  }
   0x7   :  { %s19_s29 = sshll.u32 %s401_s28, 4  ;;  %s402_s30 = smov 16   ;;  %s20_s29 = int_to_ptr.vmem [resolvable:$true] %s19_s29 }
   0x8   :  { %s403_s6 = smov 1   ;;  %s45_s8 = sshll.u32 %s466_s3, 4  ;;  %s46_s8 = int_to_ptr.hbm [resolvable:$true] %s45_s8 }
   0x9   :  { %25 = dma.hbm_to_vmem [thread:$0]  %s18_s25, 16, %s20_s29, [#allocation4], %s402_s30, %s402_s30, %s403_s6  }
   0xa   :  { %s404_s9 = smov [#allocation8]  }
   0xb   :  { %s47_s10 = sshll.u32 %s404_s9, 4  ;;  %s48_s10 = int_to_ptr.vmem [resolvable:$true] %s47_s10 }
   0xc   :  { %53 = dma.hbm_to_vmem [thread:$0]  %s46_s8, 256, %s48_s10, [#allocation7], %s399_s26, %s399_s26, %s400_s27  }
   0xd   :  { %392 = dma.done.wait [#allocation4], 128  }
   0xe   :  { %393 = vsyncadd [#allocation4], 4294967168 }
   0xf   :  { %394 = dma.done.wait [#allocation7], 512  }
  0x10   :  { %395 = vsyncadd [#allocation7], 4294966784  ;;  %vm73_vm0 = vcmask 261120   ;;  %v405_v0 = vmov 0.0   ;;  %v260_v1 = vld [vmem:[#allocation6 + $0x8] sm:$0xff]  ;;  %v259_v2 = vld [vmem:[#allocation6] sm:$0xff] }
  0x11   :  { %74 = vst.msk [vmem:[#allocation2] sm:$0xff] %vm73_vm0, %v405_v0  ;;  %v76_v3 = vld [vmem:[#allocation3] sm:$0x1]  ;;  %v77_v4 = vld [vmem:[#allocation3 + $0x1] sm:$0x1]  ;;  %156 = vmatpush.bf16.msra.mxu0 %v260_v1  ;;  %v261_v31 = vld [vmem:[#allocation8] sm:$0xff] }
  0x12   :  { %75 = vst.msk [vmem:[#allocation2 + $0x8] sm:$0xff] %vm73_vm0, %v405_v0  ;;  %v78_v5 = vld [vmem:[#allocation3 + $0x2] sm:$0x1]  ;;  %v79_v6 = vld [vmem:[#allocation3 + $0x3] sm:$0x1]  ;;  %v84_v7 = vunpack.c.l.bf16 %v76_v3  ;;  %v85_v11 = vunpack.c.l.bf16 %v77_v4 }
  0x13   :  { %v80_v8 = vld [vmem:[#allocation3 + $0x4] sm:$0x1]  ;;  %v81_v9 = vld [vmem:[#allocation3 + $0x5] sm:$0x1]  ;;  %v82_v10 = vld [vmem:[#allocation3 + $0x6] sm:$0x1]  ;;  %v86_v12 = vunpack.c.l.bf16 %v78_v5  ;;  %v87_v13 = vunpack.c.l.bf16 %v79_v6 }
  0x14   :  { %v83_v14 = vld [vmem:[#allocation3 + $0x7] sm:$0x1]  ;;  %v88_v15 = vunpack.c.l.bf16 %v80_v8  ;;  %276 = vtanh.f32 %v84_v7  ;;  %v89_v16 = vunpack.c.l.bf16 %v81_v9  ;;  %v90_v17 = vunpack.c.l.bf16 %v82_v10  ;;  %v274_v38 = vld [vmem:[%s465_s2] ss:$0 sm:$0xff] }
  0x15   :  { %278 = vtanh.f32 %v85_v11  ;;  %157 = vmatpush.bf16.msra.mxu0 %v259_v2  ;;  %v91_v18 = vunpack.c.l.bf16 %v83_v14  ;;  %v262_v30 = vld [vmem:[#allocation8 + $0x8] sm:$0xff]  ;;  %v275_v46 = vld [vmem:[%s467_s4] ss:$0 sm:$0xff] }
  0x16   :  { %280 = vtanh.f32 %v86_v12  ;;  %211 = vmatpush.bf16.msra.mxu1 %v262_v30 }
  0x17   :  { %282 = vtanh.f32 %v87_v13 }
  0x18   :  { %284 = vtanh.f32 %v88_v15  ;;  %v100_v32 = vld [vmem:[#allocation2] sm:$0xff] }
  0x19   :  { %286 = vtanh.f32 %v89_v16  ;;  %v101_v35 = vld [vmem:[#allocation2 + $0x8] sm:$0xff] }
  0x1a   :  { %v277_v19 = vpop.eup %276  ;;  %288 = vtanh.f32 %v90_v17  ;;  %212 = vmatpush.bf16.msra.mxu1 %v261_v31 }
  0x1b   :  { %v279_v20 = vpop.eup %278  ;;  %290 = vtanh.f32 %v91_v18  ;;  %110 = vst [vmem:[#allocation1] ss:$4 sm:$0xff] %v277_v19 }
  0x1c   :  { %v281_v21 = vpop.eup %280  ;;  %112 = vst [vmem:[#allocation1 + $0x1] ss:$4 sm:$0xff] %v279_v20 }
  0x1d   :  { %v283_v22 = vpop.eup %282  ;;  %114 = vst [vmem:[#allocation1 + $0x2] ss:$4 sm:$0xff] %v281_v21 }
  0x1e   :  { %v285_v23 = vpop.eup %284  ;;  %116 = vst [vmem:[#allocation1 + $0x3] ss:$4 sm:$0xff] %v283_v22 }
  0x1f   :  { %v287_v24 = vpop.eup %286  ;;  %118 = vst [vmem:[#allocation1 + $0x20] ss:$4 sm:$0xff] %v285_v23 }
  0x20   :  { %v289_v25 = vpop.eup %288  ;;  %120 = vst [vmem:[#allocation1 + $0x21] ss:$4 sm:$0xff] %v287_v24 }
  0x21   :  { %v291_v26 = vpop.eup %290  ;;  %122 = vst [vmem:[#allocation1 + $0x22] ss:$4 sm:$0xff] %v289_v25 }
  0x22   :  { %124 = vst [vmem:[#allocation1 + $0x23] ss:$4 sm:$0xff] %v291_v26 }
  0x25   :  { %v125_v27 = vld.sshfl [vmem:[#allocation1] sm:$0xff pattern:$0x73625140] }
  0x29   :  { %v126_v28 = vld.sshfl [vmem:[#allocation1 + $0x20] sm:$0xff pattern:$0x73625140] }
  0x2a   :  { %v129_v29 = vpack.c.bf16 %v126_v28, %v125_v27 }
  0x2c   :  { %249 = vmatmul.msk.bf16.vlgmr.msra.gmra.mxu0 %vm73_vm0, %v129_v29 }
  0xa9   :  { %v159_v33 = vpop.f32.mrf.mxu0 }
  0xaa   :  { %v164_v34 = vadd.f32 %v159_v33, %v100_v32 }
  0xac   :  { %166 = vst.msk [vmem:[#allocation2] sm:$0xff] %vm73_vm0, %v164_v34 }
  0xb1   :  { %v161_v36 = vpop.f32.mrf.mxu0 }
  0xb2   :  { %v165_v37 = vadd.f32 %v161_v36, %v101_v35 }
  0xb3   :  { %v171_v39 = vld [vmem:[#allocation2] sm:$0xff] }
  0xb4   :  { %167 = vst.msk [vmem:[#allocation2 + $0x8] sm:$0xff] %vm73_vm0, %v165_v37  ;;  %v177_v40 = vadd.f32 %v274_v38, %v171_v39 }
  0xb6   :  { %292 = vtanh.f32 %v177_v40 }
  0xbb   :  { %v172_v41 = vld [vmem:[#allocation2 + $0x8] sm:$0xff] }
  0xbc   :  { %v178_v42 = vadd.f32 %v274_v38, %v172_v41  ;;  %v293_v43 = vpop.eup %292 }
  0xbe   :  { %294 = vtanh.f32 %v178_v42 }
  0xc4   :  { %v295_v44 = vpop.eup %294 }
  0xc5   :  { %v181_v45 = vpack.c.bf16 %v295_v44, %v293_v43 }
  0xc7   :  { %258 = vmatmul.msk.bf16.vlgmr.msra.gmra.mxu1 %vm73_vm0, %v181_v45 }
 0x144   :  { %v214_v47 = vpop.f32.mrf.mxu1 }
 0x145   :  { %v215_v48 = vadd.f32 %v275_v46, %v214_v47 }
 0x147   :  { %219 = vst [vmem:[#allocation9] sm:$0xff] %v215_v48 }
 0x14c   :  { %v216_v49 = vpop.f32.mrf.mxu1 }
 0x14d   :  { %v217_v50 = vadd.f32 %v275_v46, %v216_v49 }
 0x14f   :  { %220 = vst [vmem:[#allocation9 + $0x8] sm:$0xff] %v217_v50 }
 0x150   :  { %224 = vsyncadd [#allocation5], 224  ;;  %s227_s14 = sshll.u32 %s468_s5, 4  ;;  %s406_s15 = smov [#allocation9]   ;;  %s228_s14 = int_to_ptr.hbm [resolvable:$true] %s227_s14 }
 0x151   :  { %s225_s16 = sshll.u32 %s406_s15, 4  ;;  %s407_s17 = smov 32   ;;  %s226_s16 = int_to_ptr.vmem [resolvable:$true] %s225_s16 }
 0x152   :  { %s408_s18 = smov 2  }
 0x153   :  { %233 = dma.vmem_to_hbm [thread:$0]  %s226_s16, 32, %s228_s14, [#allocation5], %s407_s17, %s407_s17, %s408_s18  }
 0x154   :  { %396 = dma.done.wait [#allocation5], 256  }
 0x155   :  { %397 = vsyncadd [#allocation5], 4294967040 }
 0x156   :  { %238 = vsyncpa [#allocation4], 1 }
 0x157   :  { %239 = vsyncpa [#allocation7], 1 }
 0x158   :  { %240 = vsyncpa [#allocation5], 1 }

// kernel: tpu_custom_call.1
= control target key start
LH: loop header
LB: loop body
LE: loop exit
PB: predicated region body
PF: predicated region fallthrough
CT: control target
= control target key end

     0   :  { %10 = vsyncpa [#allocation4], 0  ;;  %s463_s0 = inlined_call_operand.hbm [shape: bf16[2,32], index: 0, kind: input, shape index: {}]   ;;  %s464_s1 = inlined_call_operand.hbm [shape: bf16[32,32], index: 1, kind: input, shape index: {}]   ;;  %s465_s2 = inlined_call_operand.vmem [shape: f32[1,32], index: 2, kind: input, shape index: {}]   ;;  %s466_s3 = inlined_call_operand.hbm [shape: bf16[32,128], index: 3, kind: input, shape index: {}]   ;;  %s467_s4 = inlined_call_operand.vmem [shape: f32[1,128], index: 4, kind: input, shape index: {}]   ;;  %s468_s5 = inlined_call_operand.hbm [shape: f32[2,128], index: 5, kind: output, shape index: {}]  }
   0x1   :  { %11 = vsyncpa [#allocation7], 0 }
   0x2   :  { %12 = vsyncpa [#allocation5], 0  ;;  %s30_s20 = sshll.u32 %s464_s1, 4  ;;  %s31_s20 = int_to_ptr.hbm [resolvable:$true] %s30_s20 }
   0x3   :  { %16 = vsyncadd [#allocation4], 112  ;;  %s398_s21 = smov [#allocation6]   ;;  %s17_s25 = sshll.u32 %s463_s0, 4  ;;  %s18_s25 = int_to_ptr.hbm [resolvable:$true] %s17_s25 }
   0x4   :  { %s32_s22 = sshll.u32 %s398_s21, 4  ;;  %s399_s26 = smov 64   ;;  %s33_s22 = int_to_ptr.vmem [resolvable:$true] %s32_s22 }
   0x5   :  { %s400_s27 = smov 4   ;;  %s401_s28 = smov [#allocation3]  }
   0x6   :  { %38 = dma.hbm_to_vmem [thread:$0]  %s31_s20, 256, %s33_s22, [#allocation7], %s399_s26, %s399_s26, %s400_s27  }
   0x7   :  { %s19_s29 = sshll.u32 %s401_s28, 4  ;;  %s402_s30 = smov 16   ;;  %s20_s29 = int_to_ptr.vmem [resolvable:$true] %s19_s29 }
   0x8   :  { %s403_s6 = smov 1   ;;  %s45_s8 = sshll.u32 %s466_s3, 4  ;;  %s46_s8 = int_to_ptr.hbm [resolvable:$true] %s45_s8 }
   0x9   :  { %25 = dma.hbm_to_vmem [thread:$0]  %s18_s25, 16, %s20_s29, [#allocation4], %s402_s30, %s402_s30, %s403_s6  }
   0xa   :  { %s404_s9 = smov [#allocation8]  }
   0xb   :  { %s47_s10 = sshll.u32 %s404_s9, 4  ;;  %s48_s10 = int_to_ptr.vmem [resolvable:$true] %s47_s10 }
   0xc   :  { %53 = dma.hbm_to_vmem [thread:$0]  %s46_s8, 256, %s48_s10, [#allocation7], %s399_s26, %s399_s26, %s400_s27  }
   0xd   :  { %392 = dma.done.wait [#allocation4], 128  }
   0xe   :  { %393 = vsyncadd [#allocation4], 4294967168 }
   0xf   :  { %394 = dma.done.wait [#allocation7], 512  }
  0x10   :  { %395 = vsyncadd [#allocation7], 4294966784  ;;  %vm73_vm0 = vcmask 261120   ;;  %v405_v0 = vmov 0.0   ;;  %v260_v1 = vld [vmem:[#allocation6 + $0x8] sm:$0xff]  ;;  %v259_v2 = vld [vmem:[#allocation6] sm:$0xff] }
  0x11   :  { %74 = vst.msk [vmem:[#allocation2] sm:$0xff] %vm73_vm0, %v405_v0  ;;  %v76_v3 = vld [vmem:[#allocation3] sm:$0x1]  ;;  %v77_v4 = vld [vmem:[#allocation3 + $0x1] sm:$0x1]  ;;  %156 = vmatpush.bf16.msra.mxu0 %v260_v1  ;;  %v261_v31 = vld [vmem:[#allocation8] sm:$0xff] }
  0x12   :  { %75 = vst.msk [vmem:[#allocation2 + $0x8] sm:$0xff] %vm73_vm0, %v405_v0  ;;  %v78_v5 = vld [vmem:[#allocation3 + $0x2] sm:$0x1]  ;;  %v79_v6 = vld [vmem:[#allocation3 + $0x3] sm:$0x1]  ;;  %v84_v7 = vunpack.c.l.bf16 %v76_v3  ;;  %v85_v11 = vunpack.c.l.bf16 %v77_v4 }
  0x13   :  { %v80_v8 = vld [vmem:[#allocation3 + $0x4] sm:$0x1]  ;;  %v81_v9 = vld [vmem:[#allocation3 + $0x5] sm:$0x1]  ;;  %v82_v10 = vld [vmem:[#allocation3 + $0x6] sm:$0x1]  ;;  %v86_v12 = vunpack.c.l.bf16 %v78_v5  ;;  %v87_v13 = vunpack.c.l.bf16 %v79_v6 }
  0x14   :  { %v83_v14 = vld [vmem:[#allocation3 + $0x7] sm:$0x1]  ;;  %v88_v15 = vunpack.c.l.bf16 %v80_v8  ;;  %276 = vtanh.f32 %v84_v7  ;;  %v89_v16 = vunpack.c.l.bf16 %v81_v9  ;;  %v90_v17 = vunpack.c.l.bf16 %v82_v10  ;;  %v274_v38 = vld [vmem:[%s465_s2] ss:$0 sm:$0xff] }
  0x15   :  { %278 = vtanh.f32 %v85_v11  ;;  %157 = vmatpush.bf16.msra.mxu0 %v259_v2  ;;  %v91_v18 = vunpack.c.l.bf16 %v83_v14  ;;  %v262_v30 = vld [vmem:[#allocation8 + $0x8] sm:$0xff]  ;;  %v275_v46 = vld [vmem:[%s467_s4] ss:$0 sm:$0xff] }
  0x16   :  { %280 = vtanh.f32 %v86_v12  ;;  %211 = vmatpush.bf16.msra.mxu1 %v262_v30 }
  0x17   :  { %282 = vtanh.f32 %v87_v13 }
  0x18   :  { %284 = vtanh.f32 %v88_v15  ;;  %v100_v32 = vld [vmem:[#allocation2] sm:$0xff] }
  0x19   :  { %286 = vtanh.f32 %v89_v16  ;;  %v101_v35 = vld [vmem:[#allocation2 + $0x8] sm:$0xff] }
  0x1a   :  { %v277_v19 = vpop.eup %276  ;;  %288 = vtanh.f32 %v90_v17  ;;  %212 = vmatpush.bf16.msra.mxu1 %v261_v31 }
  0x1b   :  { %v279_v20 = vpop.eup %278  ;;  %290 = vtanh.f32 %v91_v18  ;;  %110 = vst [vmem:[#allocation1] ss:$4 sm:$0xff] %v277_v19 }
  0x1c   :  { %v281_v21 = vpop.eup %280  ;;  %112 = vst [vmem:[#allocation1 + $0x1] ss:$4 sm:$0xff] %v279_v20 }
  0x1d   :  { %v283_v22 = vpop.eup %282  ;;  %114 = vst [vmem:[#allocation1 + $0x2] ss:$4 sm:$0xff] %v281_v21 }
  0x1e   :  { %v285_v23 = vpop.eup %284  ;;  %116 = vst [vmem:[#allocation1 + $0x3] ss:$4 sm:$0xff] %v283_v22 }
  0x1f   :  { %v287_v24 = vpop.eup %286  ;;  %118 = vst [vmem:[#allocation1 + $0x20] ss:$4 sm:$0xff] %v285_v23 }
  0x20   :  { %v289_v25 = vpop.eup %288  ;;  %120 = vst [vmem:[#allocation1 + $0x21] ss:$4 sm:$0xff] %v287_v24 }
  0x21   :  { %v291_v26 = vpop.eup %290  ;;  %122 = vst [vmem:[#allocation1 + $0x22] ss:$4 sm:$0xff] %v289_v25 }
  0x22   :  { %124 = vst [vmem:[#allocation1 + $0x23] ss:$4 sm:$0xff] %v291_v26 }
  0x25   :  { %v125_v27 = vld.sshfl [vmem:[#allocation1] sm:$0xff pattern:$0x73625140] }
  0x29   :  { %v126_v28 = vld.sshfl [vmem:[#allocation1 + $0x20] sm:$0xff pattern:$0x73625140] }
  0x2a   :  { %v129_v29 = vpack.c.bf16 %v126_v28, %v125_v27 }
  0x2c   :  { %249 = vmatmul.msk.bf16.vlgmr.msra.gmra.mxu0 %vm73_vm0, %v129_v29 }
  0xa9   :  { %v159_v33 = vpop.f32.mrf.mxu0 }
  0xaa   :  { %v164_v34 = vadd.f32 %v159_v33, %v100_v32 }
  0xac   :  { %166 = vst.msk [vmem:[#allocation2] sm:$0xff] %vm73_vm0, %v164_v34 }
  0xb1   :  { %v161_v36 = vpop.f32.mrf.mxu0 }
  0xb2   :  { %v165_v37 = vadd.f32 %v161_v36, %v101_v35 }
  0xb3   :  { %v171_v39 = vld [vmem:[#allocation2] sm:$0xff] }
  0xb4   :  { %167 = vst.msk [vmem:[#allocation2 + $0x8] sm:$0xff] %vm73_vm0, %v165_v37  ;;  %v177_v40 = vadd.f32 %v274_v38, %v171_v39 }
  0xb6   :  { %292 = vtanh.f32 %v177_v40 }
  0xbb   :  { %v172_v41 = vld [vmem:[#allocation2 + $0x8] sm:$0xff] }
  0xbc   :  { %v178_v42 = vadd.f32 %v274_v38, %v172_v41  ;;  %v293_v43 = vpop.eup %292 }
  0xbe   :  { %294 = vtanh.f32 %v178_v42 }
  0xc4   :  { %v295_v44 = vpop.eup %294 }
  0xc5   :  { %v181_v45 = vpack.c.bf16 %v295_v44, %v293_v43 }
  0xc7   :  { %258 = vmatmul.msk.bf16.vlgmr.msra.gmra.mxu1 %vm73_vm0, %v181_v45 }
 0x144   :  { %v214_v47 = vpop.f32.mrf.mxu1 }
 0x145   :  { %v215_v48 = vadd.f32 %v275_v46, %v214_v47 }
 0x147   :  { %219 = vst [vmem:[#allocation9] sm:$0xff] %v215_v48 }
 0x14c   :  { %v216_v49 = vpop.f32.mrf.mxu1 }
 0x14d   :  { %v217_v50 = vadd.f32 %v275_v46, %v216_v49 }
 0x14f   :  { %220 = vst [vmem:[#allocation9 + $0x8] sm:$0xff] %v217_v50 }
 0x150   :  { %224 = vsyncadd [#allocation5], 224  ;;  %s227_s14 = sshll.u32 %s468_s5, 4  ;;  %s406_s15 = smov [#allocation9]   ;;  %s228_s14 = int_to_ptr.hbm [resolvable:$true] %s227_s14 }
 0x151   :  { %s225_s16 = sshll.u32 %s406_s15, 4  ;;  %s407_s17 = smov 32   ;;  %s226_s16 = int_to_ptr.vmem [resolvable:$true] %s225_s16 }
 0x152   :  { %s408_s18 = smov 2  }
 0x153   :  { %233 = dma.vmem_to_hbm [thread:$0]  %s226_s16, 32, %s228_s14, [#allocation5], %s407_s17, %s407_s17, %s408_s18  }
 0x154   :  { %396 = dma.done.wait [#allocation5], 256  }
 0x155   :  { %397 = vsyncadd [#allocation5], 4294967040 }
 0x156   :  { %238 = vsyncpa [#allocation4], 1 }
 0x157   :  { %239 = vsyncpa [#allocation7], 1 }
 0x158   :  { %240 = vsyncpa [#allocation5], 1 }

</bundles_post_ra>
